<compile_context>
chip_gen: v7x
topology: tpu7x:2x2x1
jax: 0.10.0
libtpu: 0.0.40
codegen_flags: <defaults>
</compile_context>

<pallas_src>
import jax
import jax.numpy as jnp
from jax.experimental import pallas as pl
from jax.experimental.pallas import tpu as pltpu

LANE = 128  # lane-dense padded width for the hidden features (MXU-friendly)


def qnet_kernel(x_ref, w1_ref, b1_ref, w2_ref, b2_ref, w3_ref, b3_ref, o_ref):
    cdt = w1_ref.dtype                      # MXU operand dtype (f32 default, bf16 opt-in)
    x = x_ref[...].astype(cdt)              # no-op cast on the default f32 path
    # fc1 + relu  (f32 accumulate, f32 epilogue)
    h = jnp.dot(x, w1_ref[...], preferred_element_type=jnp.float32)
    h = jnp.maximum(h + b1_ref[...], 0.0)
    # fc2 + relu
    h = jnp.dot(h.astype(cdt), w2_ref[...], preferred_element_type=jnp.float32)
    h = jnp.maximum(h + b2_ref[...], 0.0)
    # fc3 (no activation) -> native (bm, action_dim) result, stored directly
    out = jnp.dot(h.astype(cdt), w3_ref[...], preferred_element_type=jnp.float32)
    o_ref[...] = (out + b3_ref[...]).astype(o_ref.dtype)


def _round_up(v, m):
    return ((v + m - 1) // m) * m


def _vmem_estimate_bytes(bm, state_dim, action_dim):
    """Conservative VMEM footprint: double-buffered in/out tiles (lane-padded)
    plus resident weights/biases, all f32."""
    pad = lambda n: _round_up(n, LANE)
    in_tile = bm * pad(state_dim) * 4
    out_tile = bm * pad(action_dim) * 4
    weights = (state_dim * LANE + LANE            # w1, b1
               + LANE * LANE + LANE               # w2, b2
               + LANE * action_dim + action_dim   # w3, b3
               ) * 4
    return 2 * (in_tile + out_tile) + weights


def qnetwork_forward(x, packed, action_dim, *, bm=2048):
    """x: (B, state_dim) f32; packed: padded params from pack_params.
    Returns (B, action_dim) f32 Q-values."""
    w1, b1, w2, b2, w3, b3 = (packed[k] for k in ("w1", "b1", "w2", "b2", "w3", "b3"))
    B, state_dim = x.shape

    # Pick the batch tile: sublane-legal (multiple of 8 or == B), and with at
    # least 2 grid steps when B > 8 so v7x's two TensorCores both get work.
    if B <= 8:
        bm = B
    else:
        bm = _round_up(max(bm, 8), 8)
        bm = max(8, min(bm, _round_up(pl.cdiv(B, 2), 8)))
    grid = (pl.cdiv(B, bm),)

    # Raise the scoped-VMEM limit only when big tiles would exceed the most
    # conservative platform default (v5e: 16 MiB); cap under v7x's 64 MiB.
    est = _vmem_estimate_bytes(bm, state_dim, action_dim)
    vmem_limit = min(est + (4 << 20), 48 << 20) if est > (12 << 20) else None

    resident = lambda a: pl.BlockSpec(a.shape, lambda i: (0,) * a.ndim)
    return pl.pallas_call(
        qnet_kernel,
        out_shape=jax.ShapeDtypeStruct((B, action_dim), jnp.float32),
        grid=grid,
        in_specs=[
            pl.BlockSpec((bm, state_dim), lambda i: (i, 0)),     # batch-tiled input
            resident(w1), resident(b1),
            resident(w2), resident(b2),
            resident(w3), resident(b3),
        ],
        out_specs=pl.BlockSpec((bm, action_dim), lambda i: (i, 0)),  # native-width output
        compiler_params=pltpu.CompilerParams(
            dimension_semantics=("parallel",),                   # megacore on v7x
            vmem_limit_bytes=vmem_limit),
    )(x, w1, b1, w2, b2, w3, b3)


def init_params(key, state_dim, action_dim):
    """Logical (unpadded) params matching nn.Linear, stored transposed (in, out)."""
    ks = jax.random.split(key, 6)

    def lin(kw, kb, fan_in, fan_out):
        bound = 1.0 / jnp.sqrt(fan_in)
        w = jax.random.uniform(kw, (fan_in, fan_out), jnp.float32, -bound, bound)
        b = jax.random.uniform(kb, (fan_out,), jnp.float32, -bound, bound)
        return w, b

    w1, b1 = lin(ks[0], ks[1], state_dim, 64)
    w2, b2 = lin(ks[2], ks[3], 64, 64)
    w3, b3 = lin(ks[4], ks[5], 64, action_dim)
    return dict(w1=w1, b1=b1, w2=w2, b2=b2, w3=w3, b3=b3)


def pack_params(p, *, compute_dtype=jnp.float32):
    """Pad hidden feature dims to 128 lanes for the MXU; the last layer keeps
    its native output width (action_dim) so the store is not inflated.
    Biases stay f32 so the bias+ReLU epilogue is f32 on every generation."""
    def padw(w, rows_to, cols_to):
        r, c = w.shape
        return jnp.pad(w, ((0, rows_to - r), (0, cols_to - c))).astype(compute_dtype)

    def padb(b, cols_to):
        return jnp.pad(b, (0, cols_to - b.shape[0])).reshape(1, cols_to).astype(jnp.float32)

    state_dim = p["w1"].shape[0]
    action_dim = p["w3"].shape[1]
    return dict(
        w1=padw(p["w1"], state_dim, LANE), b1=padb(p["b1"], LANE),
        w2=padw(p["w2"], LANE, LANE),      b2=padb(p["b2"], LANE),
        w3=padw(p["w3"], LANE, action_dim), b3=padb(p["b3"], action_dim),
    )


def qnetwork_ref(x, p):
    h = jnp.maximum(x @ p["w1"] + p["b1"], 0.0)
    h = jnp.maximum(h @ p["w2"] + p["b2"], 0.0)
    return h @ p["w3"] + p["b3"]


if __name__ == "__main__":
    key = jax.random.PRNGKey(0)
    kx, kp = jax.random.split(key)

    batch, state_dim, action_dim = 256, 8, 4
    x = jax.random.normal(kx, (batch, state_dim), jnp.float32)
    params = init_params(kp, state_dim, action_dim)
    ref = qnetwork_ref(x, params)

    # Default f32 MXU operands (exact path).  With B=256 the tile clamps to
    # bm=128 -> grid=(2,) so v7x gets both TensorCores.
    packed = pack_params(params, compute_dtype=jnp.float32)
    out = qnetwork_forward(x, packed, action_dim)
    jax.block_until_ready(out)
    assert out.shape == (batch, action_dim)
    assert jnp.allclose(out, ref, atol=1e-4, rtol=1e-4)

    # Small-batch path (bm == B, full-dim block).
    out_small = qnetwork_forward(x[:2], packed, action_dim)
    jax.block_until_ready(out_small)
    assert jnp.allclose(out_small, ref[:2], atol=1e-4, rtol=1e-4)

    # Optional bf16 MXU operands (v6e/v7x only if the MXU ever binds), f32 accum.
    out_bf16 = qnetwork_forward(x, pack_params(params, compute_dtype=jnp.bfloat16), action_dim)
    jax.block_until_ready(out_bf16)
    assert jnp.allclose(out_bf16, ref, atol=5e-2, rtol=5e-2)

    print("KERNEL_OK")
</pallas_src>

<mosaic_0001>
module attributes {stable_mosaic.version = 11 : i64} {
  func.func @qnet_kernel(%arg0: i32, %arg1: memref<128x8xf32, #tpu.memory_space<vmem>>, %arg2: memref<8x128xf32, #tpu.memory_space<vmem>>, %arg3: memref<1x128xf32, #tpu.memory_space<vmem>>, %arg4: memref<128x128xf32, #tpu.memory_space<vmem>>, %arg5: memref<1x128xf32, #tpu.memory_space<vmem>>, %arg6: memref<128x4xf32, #tpu.memory_space<vmem>>, %arg7: memref<1x4xf32, #tpu.memory_space<vmem>>, %arg8: memref<128x4xf32, #tpu.memory_space<vmem>>) attributes {dimension_semantics = [#tpu.dimension_semantics<parallel>], iteration_bounds = array<i64: 2>, scalar_prefetch = 0 : i64, scratch_operands = 0 : i64, tpu.core_type = #tpu.core_type<tc>, window_params = [{transform_indices = @transform_0, window_bounds = array<i64: 128, 8>}, {pipeline_mode = #tpu.pipeline_mode<synchronous>, transform_indices = @transform_1, window_bounds = array<i64: 8, 128>}, {pipeline_mode = #tpu.pipeline_mode<synchronous>, transform_indices = @transform_2, window_bounds = array<i64: 1, 128>}, {pipeline_mode = #tpu.pipeline_mode<synchronous>, transform_indices = @transform_3, window_bounds = array<i64: 128, 128>}, {pipeline_mode = #tpu.pipeline_mode<synchronous>, transform_indices = @transform_4, window_bounds = array<i64: 1, 128>}, {pipeline_mode = #tpu.pipeline_mode<synchronous>, transform_indices = @transform_5, window_bounds = array<i64: 128, 4>}, {pipeline_mode = #tpu.pipeline_mode<synchronous>, transform_indices = @transform_6, window_bounds = array<i64: 1, 4>}, {transform_indices = @transform_7, window_bounds = array<i64: 128, 4>}]} {
    %c0 = arith.constant 0 : index
    %c0_0 = arith.constant 0 : index
    %0 = vector.load %arg1[%c0, %c0_0] : memref<128x8xf32, #tpu.memory_space<vmem>>, vector<128x8xf32>
    %c0_1 = arith.constant 0 : index
    %c0_2 = arith.constant 0 : index
    %1 = vector.load %arg2[%c0_1, %c0_2] : memref<8x128xf32, #tpu.memory_space<vmem>>, vector<8x128xf32>
    %cst = arith.constant dense<0.000000e+00> : vector<128x128xf32>
    %2 = tpu.matmul %0, %1, %cst {dimension_numbers = #tpu.dot_dimension_numbers<[1], [0], [0], [1], [0, 0, 1, 1], [], []>} : vector<128x8xf32>, vector<8x128xf32>, vector<128x128xf32> -> vector<128x128xf32>
    %c0_3 = arith.constant 0 : index
    %c0_4 = arith.constant 0 : index
    %3 = vector.load %arg3[%c0_3, %c0_4] : memref<1x128xf32, #tpu.memory_space<vmem>>, vector<1x128xf32>
    %4 = vector.broadcast %3 : vector<1x128xf32> to vector<128x128xf32>
    %5 = arith.addf %2, %4 : vector<128x128xf32>
    %cst_5 = arith.constant 0.000000e+00 : f32
    %6 = vector.broadcast %cst_5 : f32 to vector<128x128xf32>
    %7 = arith.maximumf %5, %6 : vector<128x128xf32>
    %c0_6 = arith.constant 0 : index
    %c0_7 = arith.constant 0 : index
    %8 = vector.load %arg4[%c0_6, %c0_7] : memref<128x128xf32, #tpu.memory_space<vmem>>, vector<128x128xf32>
    %cst_8 = arith.constant dense<0.000000e+00> : vector<128x128xf32>
    %9 = tpu.matmul %7, %8, %cst_8 {dimension_numbers = #tpu.dot_dimension_numbers<[1], [0], [0], [1], [0, 0, 1, 1], [], []>} : vector<128x128xf32>, vector<128x128xf32>, vector<128x128xf32> -> vector<128x128xf32>
    %c0_9 = arith.constant 0 : index
    %c0_10 = arith.constant 0 : index
    %10 = vector.load %arg5[%c0_9, %c0_10] : memref<1x128xf32, #tpu.memory_space<vmem>>, vector<1x128xf32>
    %11 = vector.broadcast %10 : vector<1x128xf32> to vector<128x128xf32>
    %12 = arith.addf %9, %11 : vector<128x128xf32>
    %cst_11 = arith.constant 0.000000e+00 : f32
    %13 = vector.broadcast %cst_11 : f32 to vector<128x128xf32>
    %14 = arith.maximumf %12, %13 : vector<128x128xf32>
    %c0_12 = arith.constant 0 : index
    %c0_13 = arith.constant 0 : index
    %15 = vector.load %arg6[%c0_12, %c0_13] : memref<128x4xf32, #tpu.memory_space<vmem>>, vector<128x4xf32>
    %cst_14 = arith.constant dense<0.000000e+00> : vector<128x4xf32>
    %16 = tpu.matmul %14, %15, %cst_14 {dimension_numbers = #tpu.dot_dimension_numbers<[1], [0], [0], [1], [0, 0, 1, 1], [], []>} : vector<128x128xf32>, vector<128x4xf32>, vector<128x4xf32> -> vector<128x4xf32>
    %c0_15 = arith.constant 0 : index
    %c0_16 = arith.constant 0 : index
    %17 = vector.load %arg7[%c0_15, %c0_16] : memref<1x4xf32, #tpu.memory_space<vmem>>, vector<1x4xf32>
    %18 = vector.broadcast %17 : vector<1x4xf32> to vector<128x4xf32>
    %19 = arith.addf %16, %18 : vector<128x4xf32>
    %c0_17 = arith.constant 0 : index
    %c0_18 = arith.constant 0 : index
    %20 = vector.load %arg8[%c0_17, %c0_18] : memref<128x4xf32, #tpu.memory_space<vmem>>, vector<128x4xf32>
    tpu.vector_store %arg8[%c0_17, %c0_18], %19 {strides = array<i32>} : memref<128x4xf32, #tpu.memory_space<vmem>>, vector<128x4xf32>,
    return
  }
  func.func @transform_0(%arg0: i32) -> (i32, i32) {
    %c0_i32 = arith.constant 0 : i32
    %c0_i32_0 = arith.constant 0 : i32
    return %arg0, %c0_i32 : i32, i32
  }
  func.func @transform_1(%arg0: i32) -> (i32, i32) {
    %c0_i32 = arith.constant 0 : i32
    %c0_i32_0 = arith.constant 0 : i32
    %c0_i32_1 = arith.constant 0 : i32
    return %c0_i32, %c0_i32_0 : i32, i32
  }
  func.func @transform_2(%arg0: i32) -> (i32, i32) {
    %c0_i32 = arith.constant 0 : i32
    %c0_i32_0 = arith.constant 0 : i32
    %c0_i32_1 = arith.constant 0 : i32
    return %c0_i32, %c0_i32_0 : i32, i32
  }
  func.func @transform_3(%arg0: i32) -> (i32, i32) {
    %c0_i32 = arith.constant 0 : i32
    %c0_i32_0 = arith.constant 0 : i32
    %c0_i32_1 = arith.constant 0 : i32
    return %c0_i32, %c0_i32_0 : i32, i32
  }
  func.func @transform_4(%arg0: i32) -> (i32, i32) {
    %c0_i32 = arith.constant 0 : i32
    %c0_i32_0 = arith.constant 0 : i32
    %c0_i32_1 = arith.constant 0 : i32
    return %c0_i32, %c0_i32_0 : i32, i32
  }
  func.func @transform_5(%arg0: i32) -> (i32, i32) {
    %c0_i32 = arith.constant 0 : i32
    %c0_i32_0 = arith.constant 0 : i32
    %c0_i32_1 = arith.constant 0 : i32
    return %c0_i32, %c0_i32_0 : i32, i32
  }
  func.func @transform_6(%arg0: i32) -> (i32, i32) {
    %c0_i32 = arith.constant 0 : i32
    %c0_i32_0 = arith.constant 0 : i32
    %c0_i32_1 = arith.constant 0 : i32
    return %c0_i32, %c0_i32_0 : i32, i32
  }
  func.func @transform_7(%arg0: i32) -> (i32, i32) {
    %c0_i32 = arith.constant 0 : i32
    %c0_i32_0 = arith.constant 0 : i32
    return %arg0, %c0_i32 : i32, i32
  }
}

</mosaic_0001>

<bundles_post_ra>
// kernel: tpu_custom_call.1
= control target key start
LH: loop header
LB: loop body
LE: loop exit
PB: predicated region body
PF: predicated region fallthrough
CT: control target
= control target key end

     0   :  { %s1310_s24 = smov 0   ;;  %s1510_s0 = inlined_call_operand.vmem [shape: f32[256,8], index: 0, kind: input, shape index: {}]   ;;  %s1511_s1 = inlined_call_operand.vmem [shape: f32[8,128], index: 1, kind: input, shape index: {}]   ;;  %s1512_s2 = inlined_call_operand.vmem [shape: f32[1,128], index: 2, kind: input, shape index: {}]   ;;  %s1513_s3 = inlined_call_operand.vmem [shape: f32[128,128], index: 3, kind: input, shape index: {}]   ;;  %s1514_s4 = inlined_call_operand.vmem [shape: f32[1,128], index: 4, kind: input, shape index: {}]   ;;  %s1515_s5 = inlined_call_operand.vmem [shape: f32[128,4], index: 5, kind: input, shape index: {}]   ;;  %s1516_s6 = inlined_call_operand.vmem [shape: f32[1,4], index: 6, kind: input, shape index: {}]   ;;  %s1517_s7 = inlined_call_operand.vmem [shape: f32[256,4], index: 7, kind: output, shape index: {}]  }
   0x1 LB: > { %s941_s25 = sadd.s32 4294967295, %s1268_s24   ;;  %p945_p0 = scmp.ge.s32.totalorder %s1268_s24, 1  ;;  %s1268_s24 = sphi %s1310_s24, %s17_s24  }
   0x2   : > { %p238_p1 = scmp.lt.s32.totalorder %s1268_s24, 3 }
   0x4   : > { %p239_p2 = pnand %p945_p0, %p238_p1 }
   0x5   : > { %v298_v0 = vld [vmem:[%s1511_s1] sm:$0xff] (!%p239_p2)  ;;  %s946_s28 = sshll.u32 (!%p239_p2), %s941_s25, 4  ;;  %v517_v2 = vld [vmem:[%s1513_s3 + $0x8] sm:$0xff] (!%p239_p2)  ;;  %v518_v4 = vld [vmem:[%s1513_s3 + $0x10] sm:$0xff] (!%p239_p2)  ;;  %vm306_vm0 = vcmask (!%p239_p2), 64512   ;;  %vm868_vm1 = vcmask (!%p239_p2), 31744  }
   0x6   : > { %242 = sbr.rel (%p239_p2) target bundleno = 698 (0x2ba), region = 48  ;;  %v516_v1 = vld [vmem:[%s1513_s3] sm:$0xff] (!%p239_p2)  ;;  %1052 = vmatprep.subr.mxu0 (!%p239_p2), %v298_v0  ;;  %p271_p3 = scmp.lt.s32.totalorder (!%p239_p2), %s946_s28, 31  ;;  %v519_v5 = vld [vmem:[%s1513_s3 + $0x18] sm:$0xff] (!%p239_p2)  ;;  %v521_v8 = vld [vmem:[%s1513_s3 + $0x28] sm:$0xff] (!%p239_p2) }
   0x7   : > { %v1190_v3 = vpack.c.bf16 (!%p239_p2), %v517_v2, %v516_v1  ;;  %1053 = vmatpush3.msra.mxu0 (!%p239_p2), %v298_v0  ;;  %v1194_v6 = vpack.c.bf16 (!%p239_p2), %v519_v5, %v518_v4  ;;  %v520_v7 = vld [vmem:[%s1513_s3 + $0x20] sm:$0xff] (!%p239_p2)  ;;  %v522_v10 = vld [vmem:[%s1513_s3 + $0x30] sm:$0xff] (!%p239_p2)  ;;  %v523_v11 = vld [vmem:[%s1513_s3 + $0x38] sm:$0xff] (!%p239_p2) }
   0x8   : > { %v1198_v9 = vpack.c.bf16 (!%p239_p2), %v521_v8, %v520_v7  ;;  %v1202_v15 = vpack.c.bf16 (!%p239_p2), %v523_v11, %v522_v10  ;;  %v524_v17 = vld [vmem:[%s1513_s3 + $0x40] sm:$0xff] (!%p239_p2)  ;;  %v525_v18 = vld [vmem:[%s1513_s3 + $0x48] sm:$0xff] (!%p239_p2)  ;;  %v526_v22 = vld [vmem:[%s1513_s3 + $0x50] sm:$0xff] (!%p239_p2) }
   0x9   : > { %1191 = vmatprep.subr.bf16.mxu1 (!%p239_p2), %v1190_v3  ;;  %v1206_v20 = vpack.c.bf16 (!%p239_p2), %v525_v18, %v524_v17  ;;  %v527_v23 = vld [vmem:[%s1513_s3 + $0x58] sm:$0xff] (!%p239_p2)  ;;  %v528_v27 = vld [vmem:[%s1513_s3 + $0x60] sm:$0xff] (!%p239_p2)  ;;  %v529_v28 = vld [vmem:[%s1513_s3 + $0x68] sm:$0xff] (!%p239_p2) }
   0xa   : > { %1193 = vmatpush3.bf16.msra.mxu1 (!%p239_p2), %v1190_v3  ;;  %v1210_v25 = vpack.c.bf16 (!%p239_p2), %v527_v23, %v526_v22  ;;  %v1214_v30 = vpack.c.bf16 (!%p239_p2), %v529_v28, %v528_v27  ;;  %v530_v38 = vld [vmem:[%s1513_s3 + $0x70] sm:$0xff] (!%p239_p2)  ;;  %v531_v39 = vld [vmem:[%s1513_s3 + $0x78] sm:$0xff] (!%p239_p2)  ;;  %v700_v41 = vld [vmem:[%s1515_s5] sm:$0xff] (!%p239_p2) }
   0xb   : > { %1195 = vmatprep.subr.bf16.mxu1 (!%p239_p2), %v1194_v6  ;;  %v1218_v40 = vpack.c.bf16 (!%p239_p2), %v531_v39, %v530_v38  ;;  %v701_v42 = vld [vmem:[%s1515_s5 + $0x8] sm:$0xff] (!%p239_p2)  ;;  %v702_v43 = vld [vmem:[%s1515_s5 + $0x10] sm:$0xff] (!%p239_p2)  ;;  %v703_v45 = vld [vmem:[%s1515_s5 + $0x18] sm:$0xff] (!%p239_p2) }
   0xc   : > { %v1222_v44 = vpack.c.bf16 (!%p239_p2), %v701_v42, %v700_v41  ;;  %v1226_v46 = vpack.c.bf16 (!%p239_p2), %v703_v45, %v702_v43  ;;  %v704_v47 = vld [vmem:[%s1515_s5 + $0x20] sm:$0xff] (!%p239_p2)  ;;  %v705_v48 = vld [vmem:[%s1515_s5 + $0x28] sm:$0xff] (!%p239_p2)  ;;  %v706_v50 = vld [vmem:[%s1515_s5 + $0x30] sm:$0xff] (!%p239_p2) }
   0xd   : > { %s1519_s28 = smov (!%p271_p3, %s946_s28), 31  ;;  %v1230_v49 = vpack.c.bf16 %v705_v48, %v704_v47  ;;  %v707_v51 = vld [vmem:[%s1515_s5 + $0x38] sm:$0xff]  ;;  %v708_v53 = vld [vmem:[%s1515_s5 + $0x40] sm:$0xff]  ;;  %v709_v54 = vld [vmem:[%s1515_s5 + $0x48] sm:$0xff] }
   0xe   : > { %s947_s18 = sshll.u32 %s1519_s28, 3  ;;  %1197 = vmatpush3.bf16.msra.mxu1 %v1194_v6  ;;  %1223 = vmatprep.subr.bf16.mxu0 %v1222_v44  ;;  %v1234_v52 = vpack.c.bf16 %v707_v51, %v706_v50  ;;  %v1238_v55 = vpack.c.bf16 %v709_v54, %v708_v53  ;;  %v710_v56 = vld [vmem:[%s1515_s5 + $0x50] sm:$0xff]  ;;  %v711_v57 = vld [vmem:[%s1515_s5 + $0x58] sm:$0xff]  ;;  %v712_v59 = vld [vmem:[%s1515_s5 + $0x60] sm:$0xff] }
   0xf   : > { %s1347_s21 = scalar_lea.vmem %s1510_s0, %s947_s18  ;;  %1199 = vmatprep.subr.bf16.mxu1 %v1198_v9  ;;  %v1242_v58 = vpack.c.bf16 %v711_v57, %v710_v56  ;;  %v713_v60 = vld [vmem:[%s1515_s5 + $0x68] sm:$0xff]  ;;  %v950_v62 = vld [vmem:[%s1512_s2] ss:$0 sm:$0xff]  ;;  %v714_v47 = vld [vmem:[%s1515_s5 + $0x70] sm:$0xff]  ;;  %s1473_s23 = scalar_lea.vmem %s1517_s7, %s947_s18 }
  0x10   : > { %v282_v12 = vld [vmem:[%s1347_s21] sm:$0xff]  ;;  %v283_v13 = vld [vmem:[%s1347_s21 + $0x8] sm:$0xff]  ;;  %v284_v14 = vld [vmem:[%s1347_s21 + $0x10] sm:$0xff]  ;;  %v1246_v61 = vpack.c.bf16 %v713_v60, %v712_v59 }
  0x11   : > { %1054 = vmatprep.mubr.msk.f32.mxu0 %vm306_vm0, %v282_v12  ;;  %v285_v16 = vld [vmem:[%s1347_s21 + $0x18] sm:$0xff]  ;;  %v286_v19 = vld [vmem:[%s1347_s21 + $0x20] sm:$0xff]  ;;  %v287_v21 = vld [vmem:[%s1347_s21 + $0x28] sm:$0xff] }
  0x12   : > { %1055 = vmatmul.mubr.msk.f32.vlgmr.msra.gmra.mrb[0].mxu0 %vm306_vm0, %v283_v13  ;;  %1201 = vmatpush3.bf16.msra.mxu1 %v1198_v9  ;;  %v288_v24 = vld [vmem:[%s1347_s21 + $0x30] sm:$0xff]  ;;  %v289_v26 = vld [vmem:[%s1347_s21 + $0x38] sm:$0xff]  ;;  %v290_v29 = vld [vmem:[%s1347_s21 + $0x40] sm:$0xff] }
  0x13   : > { %1057 = vmatprep.mubr.msk.f32.mxu0 %vm306_vm0, %v284_v14  ;;  %1203 = vmatprep.subr.bf16.mxu1 %v1202_v15  ;;  %v291_v31 = vld [vmem:[%s1347_s21 + $0x48] sm:$0xff]  ;;  %v292_v32 = vld [vmem:[%s1347_s21 + $0x50] sm:$0xff]  ;;  %v293_v33 = vld [vmem:[%s1347_s21 + $0x58] sm:$0xff] }
  0x14   : > { %v294_v34 = vld [vmem:[%s1347_s21 + $0x60] sm:$0xff]  ;;  %v295_v35 = vld [vmem:[%s1347_s21 + $0x68] sm:$0xff]  ;;  %v296_v36 = vld [vmem:[%s1347_s21 + $0x70] sm:$0xff]  ;;  %1225 = vmatpush3.bf16.msra.mxu0 %v1222_v44 }
  0x15   : > { %v297_v37 = vld [vmem:[%s1347_s21 + $0x78] sm:$0xff]  ;;  %1227 = vmatprep.subr.bf16.mxu0 %v1226_v46  ;;  %v967_v50 = vld [vmem:[%s1514_s4] ss:$0 sm:$0xff] }
  0x16   : > { %1058 = vmatmul.mubr.msk.f32.gmra.mrb[2].mxu0 %vm306_vm0, %v285_v16  ;;  %1205 = vmatpush3.bf16.msra.mxu1 %v1202_v15  ;;  %v715_v48 = vld [vmem:[%s1515_s5 + $0x78] sm:$0xff] }
  0x17   : > { %1060 = vmatprep.mubr.msk.f32.mxu0 %vm306_vm0, %v286_v19  ;;  %1207 = vmatprep.subr.bf16.mxu1 %v1206_v20 }
  0x18   : > { %1229 = vmatpush3.bf16.msra.mxu0 %v1226_v46 }
  0x19   : > { %1231 = vmatprep.subr.bf16.mxu0 %v1230_v49 }
  0x1a   : > { %1061 = vmatmul.mubr.msk.f32.gmra.mrb[4].mxu0 %vm306_vm0, %v287_v21  ;;  %1209 = vmatpush3.bf16.msra.mxu1 %v1206_v20 }
  0x1b   : > { %1063 = vmatprep.mubr.msk.f32.mxu0 %vm306_vm0, %v288_v24  ;;  %1211 = vmatprep.subr.bf16.mxu1 %v1210_v25 }
  0x1c   : > { %1233 = vmatpush3.bf16.msra.mxu0 %v1230_v49  ;;  %v1250_v49 = vpack.c.bf16 %v715_v48, %v714_v47 }
  0x1d   : > { %1235 = vmatprep.subr.bf16.mxu0 %v1234_v52 }
  0x1e   : > { %1064 = vmatmul.mubr.msk.f32.gmra.mrb[6].mxu0 %vm306_vm0, %v289_v26  ;;  %1213 = vmatpush3.bf16.msra.mxu1 %v1210_v25 }
  0x1f   : > { %1066 = vmatprep.mubr.msk.f32.mxu0 %vm306_vm0, %v290_v29  ;;  %1215 = vmatprep.subr.bf16.mxu1 %v1214_v30 }
  0x20   : > { %1237 = vmatpush3.bf16.msra.mxu0 %v1234_v52 }
  0x21   : > { %1239 = vmatprep.subr.bf16.mxu0 %v1238_v55 }
  0x22   : > { %1067 = vmatmul.mubr.msk.f32.gmra.mrb[8].mxu0 %vm306_vm0, %v291_v31  ;;  %1217 = vmatpush3.bf16.msra.mxu1 %v1214_v30 }
  0x23   : > { %1069 = vmatprep.mubr.msk.f32.mxu0 %vm306_vm0, %v292_v32  ;;  %1219 = vmatprep.subr.bf16.mxu1 %v1218_v40 }
  0x24   : > { %1241 = vmatpush3.bf16.msra.mxu0 %v1238_v55 }
  0x25   : > { %1243 = vmatprep.subr.bf16.mxu0 %v1242_v58 }
  0x26   : > { %1070 = vmatmul.mubr.msk.f32.gmra.mrb[10].mxu0 %vm306_vm0, %v293_v33  ;;  %1221 = vmatpush3.bf16.msra.mxu1 %v1218_v40 }
  0x27   : > { %1072 = vmatprep.mubr.msk.f32.mxu0 %vm306_vm0, %v294_v34 }
  0x28   : > { %1245 = vmatpush3.bf16.msra.mxu0 %v1242_v58 }
  0x29   : > { %1247 = vmatprep.subr.bf16.mxu0 %v1246_v61 }
  0x2a   : > { %1073 = vmatmul.mubr.msk.f32.gmra.mrb[12].mxu0 %vm306_vm0, %v295_v35 }
  0x2b   : > { %1075 = vmatprep.mubr.msk.f32.mxu0 %vm306_vm0, %v296_v36 }
  0x2c   : > { %1249 = vmatpush3.bf16.msra.mxu0 %v1246_v61 }
  0x2d   : > { %1251 = vmatprep.subr.bf16.mxu0 %v1250_v49 }
  0x2e   : > { %1076 = vmatmul.mubr.msk.f32.gmra.mrb[14].mxu0 %vm306_vm0, %v297_v37 }
  0x30   : > { %1253 = vmatpush3.bf16.msra.mxu0 %v1250_v49 }
  0xe5   : > { %v1056_v63 = vpop.f32.mrb[0].mxu0 }
  0xe6   : > { %v427_v0 = vadd.f32 %v1056_v63, %v950_v62  ;;  %v421_v1 = vpop.f32.mrb[1].mxu0 }
  0xe7   : > { %v422_v2 = vadd.f32 %v950_v62, %v421_v1 }
  0xe8   : > { %v501_v5 = vmax.f32 %v427_v0, 0.0 }
  0xe9   : > { %v1059_v3 = vpop.f32.mrb[2].mxu0  ;;  %v500_v4 = vmax.f32 %v422_v2, 0.0 }
  0xea   : > { %v437_v6 = vadd.f32 %v1059_v3, %v950_v62  ;;  %v431_v7 = vpop.f32.mrb[3].mxu0 }
  0xeb   : > { %v432_v8 = vadd.f32 %v950_v62, %v431_v7  ;;  %1110 = vmatprep.mubr.f32.mxu1 %v500_v4 }
  0xec   : > { %1111 = vmatmul.mubr.f32.vlgmr.msra.gmra.mrb[0].mxu1 %v501_v5  ;;  %v503_v11 = vmax.f32 %v437_v6, 0.0 }
  0xed   : > { %v502_v9 = vmax.f32 %v432_v8, 0.0  ;;  %v1062_v10 = vpop.f32.mrb[4].mxu0 }
  0xee   : > { %v447_v12 = vadd.f32 %v1062_v10, %v950_v62  ;;  %v441_v13 = vpop.f32.mrb[5].mxu0 }
  0xef   : > { %v442_v14 = vadd.f32 %v950_v62, %v441_v13  ;;  %1113 = vmatprep.mubr.f32.mxu1 %v502_v9 }
  0xf0   : > { %1114 = vmatmul.mubr.f32.gmra.mrb[2].mxu1 %v503_v11  ;;  %v505_v17 = vmax.f32 %v447_v12, 0.0 }
  0xf1   : > { %v504_v15 = vmax.f32 %v442_v14, 0.0  ;;  %v1065_v16 = vpop.f32.mrb[6].mxu0 }
  0xf2   : > { %v457_v18 = vadd.f32 %v1065_v16, %v950_v62  ;;  %v451_v19 = vpop.f32.mrb[7].mxu0 }
  0xf3   : > { %v452_v20 = vadd.f32 %v950_v62, %v451_v19  ;;  %1116 = vmatprep.mubr.f32.mxu1 %v504_v15 }
  0xf4   : > { %1117 = vmatmul.mubr.f32.gmra.mrb[4].mxu1 %v505_v17  ;;  %v507_v23 = vmax.f32 %v457_v18, 0.0 }
  0xf5   : > { %v506_v21 = vmax.f32 %v452_v20, 0.0  ;;  %v1068_v22 = vpop.f32.mrb[8].mxu0 }
  0xf6   : > { %v467_v24 = vadd.f32 %v1068_v22, %v950_v62  ;;  %v461_v25 = vpop.f32.mrb[9].mxu0 }
  0xf7   : > { %v462_v26 = vadd.f32 %v950_v62, %v461_v25  ;;  %1119 = vmatprep.mubr.f32.mxu1 %v506_v21 }
  0xf8   : > { %1120 = vmatmul.mubr.f32.gmra.mrb[6].mxu1 %v507_v23  ;;  %v509_v29 = vmax.f32 %v467_v24, 0.0 }
  0xf9   : > { %v508_v27 = vmax.f32 %v462_v26, 0.0  ;;  %v1071_v28 = vpop.f32.mrb[10].mxu0 }
  0xfa   : > { %v477_v30 = vadd.f32 %v1071_v28, %v950_v62  ;;  %v471_v31 = vpop.f32.mrb[11].mxu0 }
  0xfb   : > { %v472_v32 = vadd.f32 %v950_v62, %v471_v31  ;;  %1122 = vmatprep.mubr.f32.mxu1 %v508_v27 }
  0xfc   : > { %1123 = vmatmul.mubr.f32.gmra.mrb[8].mxu1 %v509_v29  ;;  %v511_v35 = vmax.f32 %v477_v30, 0.0 }
  0xfd   : > { %v510_v33 = vmax.f32 %v472_v32, 0.0  ;;  %v1074_v34 = vpop.f32.mrb[12].mxu0 }
  0xfe   : > { %v487_v36 = vadd.f32 %v1074_v34, %v950_v62  ;;  %v481_v37 = vpop.f32.mrb[13].mxu0 }
  0xff   : > { %v482_v38 = vadd.f32 %v950_v62, %v481_v37  ;;  %1125 = vmatprep.mubr.f32.mxu1 %v510_v33 }
 0x100   : > { %1126 = vmatmul.mubr.f32.gmra.mrb[10].mxu1 %v511_v35  ;;  %v513_v41 = vmax.f32 %v487_v36, 0.0  ;;  %v968_v35 = vld [vmem:[%s1516_s6] ss:$0 sm:$0xff] }
 0x101   : > { %v512_v39 = vmax.f32 %v482_v38, 0.0  ;;  %v1077_v40 = vpop.f32.mrb[14].mxu0 }
 0x102   : > { %v497_v42 = vadd.f32 %v1077_v40, %v950_v62  ;;  %v491_v43 = vpop.f32.mrb[15].mxu0 }
 0x103   : > { %v492_v44 = vadd.f32 %v950_v62, %v491_v43  ;;  %1128 = vmatprep.mubr.f32.mxu1 %v512_v39 }
 0x104   : > { %1129 = vmatmul.mubr.f32.gmra.mrb[12].mxu1 %v513_v41  ;;  %v515_v46 = vmax.f32 %v497_v42, 0.0 }
 0x105   : > { %v514_v45 = vmax.f32 %v492_v44, 0.0 }
 0x107   : > { %1131 = vmatprep.mubr.f32.mxu1 %v514_v45 }
 0x108   : > { %1132 = vmatmul.mubr.f32.gmra.mrb[14].mxu1 %v515_v46 }
 0x1bf   : > { %v1112_v51 = vpop.f32.mrb[0].mxu1 }
 0x1c0   : > { %v611_v52 = vadd.f32 %v1112_v51, %v967_v50  ;;  %v605_v53 = vpop.f32.mrb[1].mxu1 }
 0x1c1   : > { %v606_v54 = vadd.f32 %v967_v50, %v605_v53 }
 0x1c2   : > { %v685_v57 = vmax.f32 %v611_v52, 0.0 }
 0x1c3   : > { %v684_v55 = vmax.f32 %v606_v54, 0.0  ;;  %v1115_v56 = vpop.f32.mrb[2].mxu1 }
 0x1c4   : > { %v621_v58 = vadd.f32 %v1115_v56, %v967_v50  ;;  %v615_v59 = vpop.f32.mrb[3].mxu1 }
 0x1c5   : > { %v616_v60 = vadd.f32 %v967_v50, %v615_v59  ;;  %1166 = vmatprep.mubr.f32.mxu0 %v684_v55 }
 0x1c6   : > { %1167 = vmatmul.mubr.f32.vlgmr.msra.gmra.mrb[16].mxu0 %v685_v57  ;;  %v687_v63 = vmax.f32 %v621_v58, 0.0 }
 0x1c7   : > { %v686_v61 = vmax.f32 %v616_v60, 0.0  ;;  %v1118_v62 = vpop.f32.mrb[4].mxu1 }
 0x1c8   : > { %v631_v0 = vadd.f32 %v1118_v62, %v967_v50  ;;  %v625_v1 = vpop.f32.mrb[5].mxu1 }
 0x1c9   : > { %v626_v2 = vadd.f32 %v967_v50, %v625_v1  ;;  %1169 = vmatprep.mubr.f32.mxu0 %v686_v61 }
 0x1ca   : > { %1170 = vmatmul.mubr.f32.gmra.mrb[18].mxu0 %v687_v63  ;;  %v689_v5 = vmax.f32 %v631_v0, 0.0 }
 0x1cb   : > { %v688_v3 = vmax.f32 %v626_v2, 0.0  ;;  %v1121_v4 = vpop.f32.mrb[6].mxu1 }
 0x1cc   : > { %v641_v6 = vadd.f32 %v1121_v4, %v967_v50  ;;  %v635_v7 = vpop.f32.mrb[7].mxu1 }
 0x1cd   : > { %v636_v8 = vadd.f32 %v967_v50, %v635_v7  ;;  %1172 = vmatprep.mubr.f32.mxu0 %v688_v3 }
 0x1ce   : > { %1173 = vmatmul.mubr.f32.gmra.mrb[20].mxu0 %v689_v5  ;;  %v691_v11 = vmax.f32 %v641_v6, 0.0 }
 0x1cf   : > { %v690_v9 = vmax.f32 %v636_v8, 0.0  ;;  %v1124_v10 = vpop.f32.mrb[8].mxu1 }
 0x1d0   : > { %v651_v12 = vadd.f32 %v1124_v10, %v967_v50  ;;  %v645_v13 = vpop.f32.mrb[9].mxu1 }
 0x1d1   : > { %v646_v14 = vadd.f32 %v967_v50, %v645_v13  ;;  %1175 = vmatprep.mubr.f32.mxu0 %v690_v9 }
 0x1d2   : > { %1176 = vmatmul.mubr.f32.gmra.mrb[22].mxu0 %v691_v11  ;;  %v693_v17 = vmax.f32 %v651_v12, 0.0 }
 0x1d3   : > { %v692_v15 = vmax.f32 %v646_v14, 0.0  ;;  %v1127_v16 = vpop.f32.mrb[10].mxu1 }
 0x1d4   : > { %v661_v18 = vadd.f32 %v1127_v16, %v967_v50  ;;  %v655_v19 = vpop.f32.mrb[11].mxu1 }
 0x1d5   : > { %v656_v20 = vadd.f32 %v967_v50, %v655_v19  ;;  %1178 = vmatprep.mubr.f32.mxu0 %v692_v15 }
 0x1d6   : > { %1179 = vmatmul.mubr.f32.gmra.mrb[24].mxu0 %v693_v17  ;;  %v695_v23 = vmax.f32 %v661_v18, 0.0 }
 0x1d7   : > { %v694_v21 = vmax.f32 %v656_v20, 0.0  ;;  %v1130_v22 = vpop.f32.mrb[12].mxu1 }
 0x1d8   : > { %v671_v24 = vadd.f32 %v1130_v22, %v967_v50  ;;  %v665_v25 = vpop.f32.mrb[13].mxu1 }
 0x1d9   : > { %v666_v26 = vadd.f32 %v967_v50, %v665_v25  ;;  %1181 = vmatprep.mubr.f32.mxu0 %v694_v21 }
 0x1da   : > { %1182 = vmatmul.mubr.f32.gmra.mrb[26].mxu0 %v695_v23  ;;  %v697_v29 = vmax.f32 %v671_v24, 0.0 }
 0x1db   : > { %v696_v27 = vmax.f32 %v666_v26, 0.0  ;;  %v1133_v28 = vpop.f32.mrb[14].mxu1 }
 0x1dc   : > { %v681_v30 = vadd.f32 %v1133_v28, %v967_v50  ;;  %v675_v31 = vpop.f32.mrb[15].mxu1 }
 0x1dd   : > { %v676_v32 = vadd.f32 %v967_v50, %v675_v31  ;;  %1184 = vmatprep.mubr.f32.mxu0 %v696_v27 }
 0x1de   : > { %1185 = vmatmul.mubr.f32.gmra.mrb[28].mxu0 %v697_v29  ;;  %v699_v34 = vmax.f32 %v681_v30, 0.0 }
 0x1df   : > { %v698_v33 = vmax.f32 %v676_v32, 0.0 }
 0x1e1   : > { %1187 = vmatprep.mubr.f32.mxu0 %v698_v33 }
 0x1e2   : > { %1188 = vmatmul.mubr.f32.gmra.mrb[30].mxu0 %v699_v34 }
 0x299   : > { %v1168_v36 = vpop.f32.mrb[16].mxu0 }
 0x29a   : > { %v795_v37 = vadd.f32 %v1168_v36, %v968_v35  ;;  %v789_v38 = vpop.f32.mrb[17].mxu0 }
 0x29b   : > { %v790_v39 = vadd.f32 %v968_v35, %v789_v38 }
 0x29c   : > { %870 = vst.msk [vmem:[%s1473_s23 + $0x8] sm:$0xff] %vm868_vm1, %v795_v37 }
 0x29d   : > { %869 = vst.msk [vmem:[%s1473_s23] sm:$0xff] %vm868_vm1, %v790_v39  ;;  %v1171_v40 = vpop.f32.mrb[18].mxu0 }
 0x29e   : > { %v805_v41 = vadd.f32 %v1171_v40, %v968_v35  ;;  %v799_v42 = vpop.f32.mrb[19].mxu0 }
 0x29f   : > { %v800_v43 = vadd.f32 %v968_v35, %v799_v42 }
 0x2a0   : > { %872 = vst.msk [vmem:[%s1473_s23 + $0x18] sm:$0xff] %vm868_vm1, %v805_v41 }
 0x2a1   : > { %871 = vst.msk [vmem:[%s1473_s23 + $0x10] sm:$0xff] %vm868_vm1, %v800_v43  ;;  %v1174_v44 = vpop.f32.mrb[20].mxu0 }
 0x2a2   : > { %v815_v45 = vadd.f32 %v1174_v44, %v968_v35  ;;  %v809_v46 = vpop.f32.mrb[21].mxu0 }
 0x2a3   : > { %v810_v47 = vadd.f32 %v968_v35, %v809_v46 }
 0x2a4   : > { %874 = vst.msk [vmem:[%s1473_s23 + $0x28] sm:$0xff] %vm868_vm1, %v815_v45 }
 0x2a5   : > { %873 = vst.msk [vmem:[%s1473_s23 + $0x20] sm:$0xff] %vm868_vm1, %v810_v47  ;;  %v1177_v48 = vpop.f32.mrb[22].mxu0 }
 0x2a6   : > { %v825_v49 = vadd.f32 %v1177_v48, %v968_v35  ;;  %v819_v50 = vpop.f32.mrb[23].mxu0 }
 0x2a7   : > { %v820_v51 = vadd.f32 %v968_v35, %v819_v50 }
 0x2a8   : > { %876 = vst.msk [vmem:[%s1473_s23 + $0x38] sm:$0xff] %vm868_vm1, %v825_v49 }
 0x2a9   : > { %875 = vst.msk [vmem:[%s1473_s23 + $0x30] sm:$0xff] %vm868_vm1, %v820_v51  ;;  %v1180_v52 = vpop.f32.mrb[24].mxu0 }
 0x2aa   : > { %v835_v53 = vadd.f32 %v1180_v52, %v968_v35  ;;  %v829_v54 = vpop.f32.mrb[25].mxu0 }
 0x2ab   : > { %v830_v55 = vadd.f32 %v968_v35, %v829_v54 }
 0x2ac   : > { %878 = vst.msk [vmem:[%s1473_s23 + $0x48] sm:$0xff] %vm868_vm1, %v835_v53 }
 0x2ad   : > { %877 = vst.msk [vmem:[%s1473_s23 + $0x40] sm:$0xff] %vm868_vm1, %v830_v55  ;;  %v1183_v56 = vpop.f32.mrb[26].mxu0 }
 0x2ae   : > { %v845_v57 = vadd.f32 %v1183_v56, %v968_v35  ;;  %v839_v58 = vpop.f32.mrb[27].mxu0 }
 0x2af   : > { %v840_v59 = vadd.f32 %v968_v35, %v839_v58 }
 0x2b0   : > { %880 = vst.msk [vmem:[%s1473_s23 + $0x58] sm:$0xff] %vm868_vm1, %v845_v57 }
 0x2b1   : > { %879 = vst.msk [vmem:[%s1473_s23 + $0x50] sm:$0xff] %vm868_vm1, %v840_v59  ;;  %v1186_v60 = vpop.f32.mrb[28].mxu0 }
 0x2b2   : > { %v855_v61 = vadd.f32 %v1186_v60, %v968_v35  ;;  %v849_v62 = vpop.f32.mrb[29].mxu0 }
 0x2b3   : > { %v850_v63 = vadd.f32 %v968_v35, %v849_v62 }
 0x2b4   : > { %882 = vst.msk [vmem:[%s1473_s23 + $0x68] sm:$0xff] %vm868_vm1, %v855_v61 }
 0x2b5   : > { %881 = vst.msk [vmem:[%s1473_s23 + $0x60] sm:$0xff] %vm868_vm1, %v850_v63  ;;  %v1189_v0 = vpop.f32.mrb[30].mxu0 }
 0x2b6   : > { %v865_v1 = vadd.f32 %v1189_v0, %v968_v35  ;;  %v859_v2 = vpop.f32.mrb[31].mxu0 }
 0x2b7   : > { %v860_v3 = vadd.f32 %v968_v35, %v859_v2 }
 0x2b8   : > { %884 = vst.msk [vmem:[%s1473_s23 + $0x78] sm:$0xff] %vm868_vm1, %v865_v1 }
 0x2b9   : > { %883 = vst.msk [vmem:[%s1473_s23 + $0x70] sm:$0xff] %vm868_vm1, %v860_v3 }
 0x2ba PF: > { %s17_s24 = sadd.s32 1, %s1268_s24  }
 0x2bb   : > { %p14_p4 = scmp.ge.s32.totalorder %s17_s24, 4  }
 0x2bd   :  { %16 = sbr.rel (!%p14_p4) target bundleno = 1 (0x1), region = 78 }

</bundles_post_ra>
